<compile_context>
chip_gen: v6e
topology: v6e:2x2x1
jax: 0.10.0
libtpu: 0.0.40
codegen_flags: <defaults>
</compile_context>

<pallas_src>
import functools

import jax
import jax.numpy as jnp
from jax import lax
from jax.experimental import pallas as pl
from jax.experimental.pallas import tpu as pltpu


def _matching_kernel(coeff_ref, tsb_ref, tsd_ref, out_ref, *,
                     tau, ts_a, ts_c, eps, iters, unroll):
    """One batch tile.  coeff block is (n, m, TB) with batch on the lane axis.

    Preconditioned PDHG on the structured QP.  A x / C x / A^T nu / C^T lam are
    segment sums and broadcasts (VPU + XLU only, no MXU).
    """
    c = coeff_ref[...].astype(jnp.float32)            # (n, m, TB)
    n, m, TB = c.shape
    inv_prox = 1.0 / (1.0 + 2.0 * eps * tau)

    # ---- loop-invariant hoists (JAX does not CSE broadcasts inside the loop) ----
    tau_c = tau * c                                                        # (n, m, TB)
    tsb = jnp.broadcast_to(tsb_ref[...].astype(jnp.float32), (n, 1, TB))   # tau*sigma_A*b
    tsd = jnp.broadcast_to(tsd_ref[...].astype(jnp.float32), (1, m, TB))   # tau*sigma_C*d

    x0 = jnp.zeros((n, m, TB), jnp.float32)
    nuS0 = jnp.zeros((n, 1, TB), jnp.float32)          # tau * equality duals (per agent)
    lamS0 = jnp.zeros((1, m, TB), jnp.float32)         # tau * capacity duals (per target)

    def step(carry):
        x, nuS, lamS = carry
        # Duals carried pre-scaled by tau -> K^T y is a broadcast-add, no multiplies:
        #   A^T nu broadcasts nuS over the target axis, C^T lam over the agent axis.
        kty = nuS + lamS                               # broadcasts to (n, m, TB)
        # Primal prox for f(x) = -c.x + eps*||x||^2 + indicator([0,1]).
        x_new = jnp.clip((x - kty + tau_c) * inv_prox, 0.0, 1.0)
        x_bar = 2.0 * x_new - x
        # K x_bar:  A x = per-agent sums over targets (sublane/XLU reduce),
        #           C x = per-target sums over agents (n-1 VPU adds over leading axis).
        Ax = jnp.sum(x_bar, axis=1, keepdims=True)     # (n, 1, TB)
        Cx = jnp.sum(x_bar, axis=0, keepdims=True)     # (1, m, TB)
        # nu' <- nu' + tau*sigma_A*(A x_bar - b);  lam' <- [lam' + tau*sigma_C*(C x_bar - d)]_+
        nuS_new = nuS + ts_a * Ax - tsb
        lamS_new = jnp.maximum(lamS + ts_c * Cx - tsd, 0.0)
        return x_new, nuS_new, lamS_new

    def body(_, carry):
        for _ in range(unroll):                        # static unroll: longer straight-line body
            carry = step(carry)
        return carry

    carry = lax.fori_loop(0, iters // unroll, body, (x0, nuS0, lamS0))
    for _ in range(iters % unroll):                    # static remainder
        carry = step(carry)

    x, _, _ = carry
    # At the optimum  out = z - grad_z L(z, lam, nu) == z,  so return x directly.
    out_ref[...] = x.astype(out_ref.dtype)


def matching_layer_forward(lst_coeff, A_val, b_val, C_val, d_val, *,
                           iters=1024, unroll=8, batch_tile=256):
    """Pallas equivalent of MatchingLayer.forward: (B, n*m) -> (B, n*m)."""
    B, N = lst_coeff.shape
    n = A_val.shape[0]
    m = C_val.shape[0]
    assert N == n * m

    # Pock-Chambolle diagonal preconditioning for K = [A; C] with the fixed
    # structure MatchingLayer.__init__ always builds:
    #   |A| row sums = m, |C| row sums = n, every column sum of |K| = 2
    # => tau = 1/2, sigma_A = 1/m, sigma_C = 1/n  (||Sigma^{1/2} K Tau^{1/2}|| <= 1),
    # so convergence is guaranteed with far fewer iterations than scalar steps.
    eps = 1e-5
    tau = 0.5
    ts_a = tau * (1.0 / float(m))
    ts_c = tau * (1.0 / float(n))

    LANE = 128
    TB = max(LANE, (int(batch_tile) // LANE) * LANE)   # any multiple of 128 (sweepable)
    B_lanes = ((B + LANE - 1) // LANE) * LANE          # lanes actually needed
    TB = min(TB, B_lanes)
    # Keep the grid >= 2 steps whenever that is free (total lanes unchanged):
    # on v7x the ("parallel",) grid axis then shards across both TensorCores;
    # on 1-TC v5e/v6e it is cost-neutral.  For B <= 128 keep a single block
    # (duplicating work to feed a second core would cost 2x on 1-TC chips).
    if B_lanes >= 2 * LANE:
        half = ((B_lanes // 2 + LANE - 1) // LANE) * LANE
        TB = min(TB, half)
    B_pad = ((B_lanes + TB - 1) // TB) * TB

    # Lane-dense layout: batch on the 128-wide lane axis -> unmasked vector stores.
    c3 = jnp.transpose(lst_coeff, (1, 0)).reshape(n, m, B)
    if B_pad != B:
        c3 = jnp.pad(c3, ((0, 0), (0, 0), (0, B_pad - B)))
    # Pre-scale constraint RHS by tau*sigma host-side (grid-invariant, prologue-only).
    tsb3 = (ts_a * b_val.astype(jnp.float32)).reshape(n, 1, 1)
    tsd3 = (ts_c * d_val.astype(jnp.float32)).reshape(1, m, 1)

    kernel = functools.partial(_matching_kernel, tau=tau, ts_a=ts_a, ts_c=ts_c,
                               eps=eps, iters=int(iters), unroll=int(unroll))

    out3 = pl.pallas_call(
        kernel,
        out_shape=jax.ShapeDtypeStruct((n, m, B_pad), lst_coeff.dtype),
        grid=(B_pad // TB,),
        in_specs=[
            pl.BlockSpec((n, m, TB), lambda i: (0, 0, i)),
            pl.BlockSpec((n, 1, 1), lambda i: (0, 0, 0)),
            pl.BlockSpec((1, m, 1), lambda i: (0, 0, 0)),
        ],
        out_specs=pl.BlockSpec((n, m, TB), lambda i: (0, 0, i)),
        compiler_params=pltpu.CompilerParams(dimension_semantics=("parallel",)),
    )(c3, tsb3, tsd3)

    return out3[:, :, :B].reshape(N, B).transpose(1, 0)


if __name__ == "__main__":
    n, m = 4, 8          # num agents, num targets
    capacity = 1.0       # `coeff` argument of MatchingLayer.__init__
    batch = 2

    # Deterministic parameter construction, mirroring MatchingLayer.__init__
    A_val = jnp.zeros((n, n * m), jnp.float32)
    for i in range(n):
        A_val = A_val.at[i, i * m:(i + 1) * m].set(1.0)
    b_val = jnp.ones((n,), jnp.float32)
    C_val = jnp.concatenate([jnp.eye(m, dtype=jnp.float32) for _ in range(n)], axis=-1)
    d_val = jnp.ones((m,), jnp.float32) * capacity

    key = jax.random.PRNGKey(0)
    lst_coeff = jax.random.uniform(key, (batch, n * m), dtype=jnp.float32)

    sol = matching_layer_forward(lst_coeff, A_val, b_val, C_val, d_val)
    sol = jax.block_until_ready(sol)
    assert sol.shape == (batch, n * m)
    assert bool(jnp.all(jnp.isfinite(sol)))
    print("KERNEL_OK")
</pallas_src>

<mosaic_0001>
module attributes {stable_mosaic.version = 11 : i64} {
  func.func @_matching_kernel(%arg0: i32, %arg1: memref<4x8x128xf32, #tpu.memory_space<vmem>>, %arg2: memref<4x1x1xf32, #tpu.memory_space<vmem>>, %arg3: memref<1x8x1xf32, #tpu.memory_space<vmem>>, %arg4: memref<4x8x128xf32, #tpu.memory_space<vmem>>) attributes {dimension_semantics = [#tpu.dimension_semantics<parallel>], iteration_bounds = array<i64: 1>, scalar_prefetch = 0 : i64, scratch_operands = 0 : i64, tpu.core_type = #tpu.core_type<tc>, window_params = [{transform_indices = @transform_0, window_bounds = array<i64: 4, 8, 128>}, {pipeline_mode = #tpu.pipeline_mode<synchronous>, transform_indices = @transform_1, window_bounds = array<i64: 4, 1, 1>}, {pipeline_mode = #tpu.pipeline_mode<synchronous>, transform_indices = @transform_2, window_bounds = array<i64: 1, 8, 1>}, {transform_indices = @transform_3, window_bounds = array<i64: 4, 8, 128>}]} {
    %c0 = arith.constant 0 : index
    %c0_0 = arith.constant 0 : index
    %c0_1 = arith.constant 0 : index
    %0 = vector.load %arg1[%c0, %c0_0, %c0_1] : memref<4x8x128xf32, #tpu.memory_space<vmem>>, vector<4x8x128xf32>
    %cst = arith.constant 5.000000e-01 : f32
    %1 = vector.broadcast %cst : f32 to vector<4x8x128xf32>
    %2 = arith.mulf %1, %0 : vector<4x8x128xf32>
    %c0_2 = arith.constant 0 : index
    %c0_3 = arith.constant 0 : index
    %c0_4 = arith.constant 0 : index
    %3 = vector.load %arg2[%c0_2, %c0_3, %c0_4] : memref<4x1x1xf32, #tpu.memory_space<vmem>>, vector<4x1x1xf32>
    %4 = vector.shape_cast %3 : vector<4x1x1xf32> to vector<4x1x1xf32>
    %5 = vector.broadcast %4 : vector<4x1x1xf32> to vector<4x1x128xf32>
    %c0_5 = arith.constant 0 : index
    %c0_6 = arith.constant 0 : index
    %c0_7 = arith.constant 0 : index
    %6 = vector.load %arg3[%c0_5, %c0_6, %c0_7] : memref<1x8x1xf32, #tpu.memory_space<vmem>>, vector<1x8x1xf32>
    %7 = vector.shape_cast %6 : vector<1x8x1xf32> to vector<1x8x1xf32>
    %8 = vector.broadcast %7 : vector<1x8x1xf32> to vector<1x8x128xf32>
    %cst_8 = arith.constant 0.000000e+00 : f32
    %9 = vector.broadcast %cst_8 : f32 to vector<4x8x128xf32>
    %cst_9 = arith.constant 0.000000e+00 : f32
    %10 = vector.broadcast %cst_9 : f32 to vector<4x1x128xf32>
    %cst_10 = arith.constant 0.000000e+00 : f32
    %11 = vector.broadcast %cst_10 : f32 to vector<1x8x128xf32>
    %c0_i32 = arith.constant 0 : i32
    %c128_i32 = arith.constant 128 : i32
    %12 = arith.addi %c0_i32, %c128_i32 : i32
    %c1_i32 = arith.constant 1 : i32
    %13:3 = scf.for %arg5 = %c0_i32 to %12 step %c1_i32 iter_args(%arg6 = %9, %arg7 = %10, %arg8 = %11) -> (vector<4x8x128xf32>, vector<4x1x128xf32>, vector<1x8x128xf32>)  : i32 {
      %15 = vector.broadcast %arg7 : vector<4x1x128xf32> to vector<4x8x128xf32>
      %16 = vector.broadcast %arg8 : vector<1x8x128xf32> to vector<4x8x128xf32>
      %17 = arith.addf %15, %16 : vector<4x8x128xf32>
      %18 = arith.subf %arg6, %17 : vector<4x8x128xf32>
      %19 = arith.addf %18, %2 : vector<4x8x128xf32>
      %cst_14 = arith.constant 0.999989986 : f32
      %20 = vector.broadcast %cst_14 : f32 to vector<4x8x128xf32>
      %21 = arith.mulf %19, %20 : vector<4x8x128xf32>
      %cst_15 = arith.constant 0.000000e+00 : f32
      %cst_16 = arith.constant 1.000000e+00 : f32
      %22 = vector.broadcast %cst_15 : f32 to vector<4x8x128xf32>
      %23 = arith.maximumf %22, %21 : vector<4x8x128xf32>
      %24 = vector.broadcast %cst_16 : f32 to vector<4x8x128xf32>
      %25 = arith.minimumf %24, %23 : vector<4x8x128xf32>
      %cst_17 = arith.constant 2.000000e+00 : f32
      %26 = vector.broadcast %cst_17 : f32 to vector<4x8x128xf32>
      %27 = arith.mulf %26, %25 : vector<4x8x128xf32>
      %28 = arith.subf %27, %arg6 : vector<4x8x128xf32>
      %cst_18 = arith.constant dense<0.000000e+00> : vector<4x128xf32>
      %29 = vector.multi_reduction <add>, %28, %cst_18 [1] : vector<4x8x128xf32> to vector<4x128xf32>
      %30 = vector.shape_cast %29 : vector<4x128xf32> to vector<4x1x128xf32>
      %cst_19 = arith.constant dense<0.000000e+00> : vector<8x128xf32>
      %31 = vector.multi_reduction <add>, %28, %cst_19 [0] : vector<4x8x128xf32> to vector<8x128xf32>
      %32 = vector.shape_cast %31 : vector<8x128xf32> to vector<1x8x128xf32>
      %cst_20 = arith.constant 6.250000e-02 : f32
      %33 = vector.broadcast %cst_20 : f32 to vector<4x1x128xf32>
      %34 = arith.mulf %33, %30 : vector<4x1x128xf32>
      %35 = arith.addf %arg7, %34 : vector<4x1x128xf32>
      %36 = arith.subf %35, %5 : vector<4x1x128xf32>
      %cst_21 = arith.constant 1.250000e-01 : f32
      %37 = vector.broadcast %cst_21 : f32 to vector<1x8x128xf32>
      %38 = arith.mulf %37, %32 : vector<1x8x128xf32>
      %39 = arith.addf %arg8, %38 : vector<1x8x128xf32>
      %40 = arith.subf %39, %8 : vector<1x8x128xf32>
      %cst_22 = arith.constant 0.000000e+00 : f32
      %41 = vector.broadcast %cst_22 : f32 to vector<1x8x128xf32>
      %42 = arith.maximumf %40, %41 : vector<1x8x128xf32>
      %43 = vector.broadcast %36 : vector<4x1x128xf32> to vector<4x8x128xf32>
      %44 = vector.broadcast %42 : vector<1x8x128xf32> to vector<4x8x128xf32>
      %45 = arith.addf %43, %44 : vector<4x8x128xf32>
      %46 = arith.subf %25, %45 : vector<4x8x128xf32>
      %47 = arith.addf %46, %2 : vector<4x8x128xf32>
      %cst_23 = arith.constant 0.999989986 : f32
      %48 = vector.broadcast %cst_23 : f32 to vector<4x8x128xf32>
      %49 = arith.mulf %47, %48 : vector<4x8x128xf32>
      %cst_24 = arith.constant 0.000000e+00 : f32
      %cst_25 = arith.constant 1.000000e+00 : f32
      %50 = vector.broadcast %cst_24 : f32 to vector<4x8x128xf32>
      %51 = arith.maximumf %50, %49 : vector<4x8x128xf32>
      %52 = vector.broadcast %cst_25 : f32 to vector<4x8x128xf32>
      %53 = arith.minimumf %52, %51 : vector<4x8x128xf32>
      %cst_26 = arith.constant 2.000000e+00 : f32
      %54 = vector.broadcast %cst_26 : f32 to vector<4x8x128xf32>
      %55 = arith.mulf %54, %53 : vector<4x8x128xf32>
      %56 = arith.subf %55, %25 : vector<4x8x128xf32>
      %cst_27 = arith.constant dense<0.000000e+00> : vector<4x128xf32>
      %57 = vector.multi_reduction <add>, %56, %cst_27 [1] : vector<4x8x128xf32> to vector<4x128xf32>
      %58 = vector.shape_cast %57 : vector<4x128xf32> to vector<4x1x128xf32>
      %cst_28 = arith.constant dense<0.000000e+00> : vector<8x128xf32>
      %59 = vector.multi_reduction <add>, %56, %cst_28 [0] : vector<4x8x128xf32> to vector<8x128xf32>
      %60 = vector.shape_cast %59 : vector<8x128xf32> to vector<1x8x128xf32>
      %cst_29 = arith.constant 6.250000e-02 : f32
      %61 = vector.broadcast %cst_29 : f32 to vector<4x1x128xf32>
      %62 = arith.mulf %61, %58 : vector<4x1x128xf32>
      %63 = arith.addf %36, %62 : vector<4x1x128xf32>
      %64 = arith.subf %63, %5 : vector<4x1x128xf32>
      %cst_30 = arith.constant 1.250000e-01 : f32
      %65 = vector.broadcast %cst_30 : f32 to vector<1x8x128xf32>
      %66 = arith.mulf %65, %60 : vector<1x8x128xf32>
      %67 = arith.addf %42, %66 : vector<1x8x128xf32>
      %68 = arith.subf %67, %8 : vector<1x8x128xf32>
      %cst_31 = arith.constant 0.000000e+00 : f32
      %69 = vector.broadcast %cst_31 : f32 to vector<1x8x128xf32>
      %70 = arith.maximumf %68, %69 : vector<1x8x128xf32>
      %71 = vector.broadcast %64 : vector<4x1x128xf32> to vector<4x8x128xf32>
      %72 = vector.broadcast %70 : vector<1x8x128xf32> to vector<4x8x128xf32>
      %73 = arith.addf %71, %72 : vector<4x8x128xf32>
      %74 = arith.subf %53, %73 : vector<4x8x128xf32>
      %75 = arith.addf %74, %2 : vector<4x8x128xf32>
      %cst_32 = arith.constant 0.999989986 : f32
      %76 = vector.broadcast %cst_32 : f32 to vector<4x8x128xf32>
      %77 = arith.mulf %75, %76 : vector<4x8x128xf32>
      %cst_33 = arith.constant 0.000000e+00 : f32
      %cst_34 = arith.constant 1.000000e+00 : f32
      %78 = vector.broadcast %cst_33 : f32 to vector<4x8x128xf32>
      %79 = arith.maximumf %78, %77 : vector<4x8x128xf32>
      %80 = vector.broadcast %cst_34 : f32 to vector<4x8x128xf32>
      %81 = arith.minimumf %80, %79 : vector<4x8x128xf32>
      %cst_35 = arith.constant 2.000000e+00 : f32
      %82 = vector.broadcast %cst_35 : f32 to vector<4x8x128xf32>
      %83 = arith.mulf %82, %81 : vector<4x8x128xf32>
      %84 = arith.subf %83, %53 : vector<4x8x128xf32>
      %cst_36 = arith.constant dense<0.000000e+00> : vector<4x128xf32>
      %85 = vector.multi_reduction <add>, %84, %cst_36 [1] : vector<4x8x128xf32> to vector<4x128xf32>
      %86 = vector.shape_cast %85 : vector<4x128xf32> to vector<4x1x128xf32>
      %cst_37 = arith.constant dense<0.000000e+00> : vector<8x128xf32>
      %87 = vector.multi_reduction <add>, %84, %cst_37 [0] : vector<4x8x128xf32> to vector<8x128xf32>
      %88 = vector.shape_cast %87 : vector<8x128xf32> to vector<1x8x128xf32>
      %cst_38 = arith.constant 6.250000e-02 : f32
      %89 = vector.broadcast %cst_38 : f32 to vector<4x1x128xf32>
      %90 = arith.mulf %89, %86 : vector<4x1x128xf32>
      %91 = arith.addf %64, %90 : vector<4x1x128xf32>
      %92 = arith.subf %91, %5 : vector<4x1x128xf32>
      %cst_39 = arith.constant 1.250000e-01 : f32
      %93 = vector.broadcast %cst_39 : f32 to vector<1x8x128xf32>
      %94 = arith.mulf %93, %88 : vector<1x8x128xf32>
      %95 = arith.addf %70, %94 : vector<1x8x128xf32>
      %96 = arith.subf %95, %8 : vector<1x8x128xf32>
      %cst_40 = arith.constant 0.000000e+00 : f32
      %97 = vector.broadcast %cst_40 : f32 to vector<1x8x128xf32>
      %98 = arith.maximumf %96, %97 : vector<1x8x128xf32>
      %99 = vector.broadcast %92 : vector<4x1x128xf32> to vector<4x8x128xf32>
      %100 = vector.broadcast %98 : vector<1x8x128xf32> to vector<4x8x128xf32>
      %101 = arith.addf %99, %100 : vector<4x8x128xf32>
      %102 = arith.subf %81, %101 : vector<4x8x128xf32>
      %103 = arith.addf %102, %2 : vector<4x8x128xf32>
      %cst_41 = arith.constant 0.999989986 : f32
      %104 = vector.broadcast %cst_41 : f32 to vector<4x8x128xf32>
      %105 = arith.mulf %103, %104 : vector<4x8x128xf32>
      %cst_42 = arith.constant 0.000000e+00 : f32
      %cst_43 = arith.constant 1.000000e+00 : f32
      %106 = vector.broadcast %cst_42 : f32 to vector<4x8x128xf32>
      %107 = arith.maximumf %106, %105 : vector<4x8x128xf32>
      %108 = vector.broadcast %cst_43 : f32 to vector<4x8x128xf32>
      %109 = arith.minimumf %108, %107 : vector<4x8x128xf32>
      %cst_44 = arith.constant 2.000000e+00 : f32
      %110 = vector.broadcast %cst_44 : f32 to vector<4x8x128xf32>
      %111 = arith.mulf %110, %109 : vector<4x8x128xf32>
      %112 = arith.subf %111, %81 : vector<4x8x128xf32>
      %cst_45 = arith.constant dense<0.000000e+00> : vector<4x128xf32>
      %113 = vector.multi_reduction <add>, %112, %cst_45 [1] : vector<4x8x128xf32> to vector<4x128xf32>
      %114 = vector.shape_cast %113 : vector<4x128xf32> to vector<4x1x128xf32>
      %cst_46 = arith.constant dense<0.000000e+00> : vector<8x128xf32>
      %115 = vector.multi_reduction <add>, %112, %cst_46 [0] : vector<4x8x128xf32> to vector<8x128xf32>
      %116 = vector.shape_cast %115 : vector<8x128xf32> to vector<1x8x128xf32>
      %cst_47 = arith.constant 6.250000e-02 : f32
      %117 = vector.broadcast %cst_47 : f32 to vector<4x1x128xf32>
      %118 = arith.mulf %117, %114 : vector<4x1x128xf32>
      %119 = arith.addf %92, %118 : vector<4x1x128xf32>
      %120 = arith.subf %119, %5 : vector<4x1x128xf32>
      %cst_48 = arith.constant 1.250000e-01 : f32
      %121 = vector.broadcast %cst_48 : f32 to vector<1x8x128xf32>
      %122 = arith.mulf %121, %116 : vector<1x8x128xf32>
      %123 = arith.addf %98, %122 : vector<1x8x128xf32>
      %124 = arith.subf %123, %8 : vector<1x8x128xf32>
      %cst_49 = arith.constant 0.000000e+00 : f32
      %125 = vector.broadcast %cst_49 : f32 to vector<1x8x128xf32>
      %126 = arith.maximumf %124, %125 : vector<1x8x128xf32>
      %127 = vector.broadcast %120 : vector<4x1x128xf32> to vector<4x8x128xf32>
      %128 = vector.broadcast %126 : vector<1x8x128xf32> to vector<4x8x128xf32>
      %129 = arith.addf %127, %128 : vector<4x8x128xf32>
      %130 = arith.subf %109, %129 : vector<4x8x128xf32>
      %131 = arith.addf %130, %2 : vector<4x8x128xf32>
      %cst_50 = arith.constant 0.999989986 : f32
      %132 = vector.broadcast %cst_50 : f32 to vector<4x8x128xf32>
      %133 = arith.mulf %131, %132 : vector<4x8x128xf32>
      %cst_51 = arith.constant 0.000000e+00 : f32
      %cst_52 = arith.constant 1.000000e+00 : f32
      %134 = vector.broadcast %cst_51 : f32 to vector<4x8x128xf32>
      %135 = arith.maximumf %134, %133 : vector<4x8x128xf32>
      %136 = vector.broadcast %cst_52 : f32 to vector<4x8x128xf32>
      %137 = arith.minimumf %136, %135 : vector<4x8x128xf32>
      %cst_53 = arith.constant 2.000000e+00 : f32
      %138 = vector.broadcast %cst_53 : f32 to vector<4x8x128xf32>
      %139 = arith.mulf %138, %137 : vector<4x8x128xf32>
      %140 = arith.subf %139, %109 : vector<4x8x128xf32>
      %cst_54 = arith.constant dense<0.000000e+00> : vector<4x128xf32>
      %141 = vector.multi_reduction <add>, %140, %cst_54 [1] : vector<4x8x128xf32> to vector<4x128xf32>
      %142 = vector.shape_cast %141 : vector<4x128xf32> to vector<4x1x128xf32>
      %cst_55 = arith.constant dense<0.000000e+00> : vector<8x128xf32>
      %143 = vector.multi_reduction <add>, %140, %cst_55 [0] : vector<4x8x128xf32> to vector<8x128xf32>
      %144 = vector.shape_cast %143 : vector<8x128xf32> to vector<1x8x128xf32>
      %cst_56 = arith.constant 6.250000e-02 : f32
      %145 = vector.broadcast %cst_56 : f32 to vector<4x1x128xf32>
      %146 = arith.mulf %145, %142 : vector<4x1x128xf32>
      %147 = arith.addf %120, %146 : vector<4x1x128xf32>
      %148 = arith.subf %147, %5 : vector<4x1x128xf32>
      %cst_57 = arith.constant 1.250000e-01 : f32
      %149 = vector.broadcast %cst_57 : f32 to vector<1x8x128xf32>
      %150 = arith.mulf %149, %144 : vector<1x8x128xf32>
      %151 = arith.addf %126, %150 : vector<1x8x128xf32>
      %152 = arith.subf %151, %8 : vector<1x8x128xf32>
      %cst_58 = arith.constant 0.000000e+00 : f32
      %153 = vector.broadcast %cst_58 : f32 to vector<1x8x128xf32>
      %154 = arith.maximumf %152, %153 : vector<1x8x128xf32>
      %155 = vector.broadcast %148 : vector<4x1x128xf32> to vector<4x8x128xf32>
      %156 = vector.broadcast %154 : vector<1x8x128xf32> to vector<4x8x128xf32>
      %157 = arith.addf %155, %156 : vector<4x8x128xf32>
      %158 = arith.subf %137, %157 : vector<4x8x128xf32>
      %159 = arith.addf %158, %2 : vector<4x8x128xf32>
      %cst_59 = arith.constant 0.999989986 : f32
      %160 = vector.broadcast %cst_59 : f32 to vector<4x8x128xf32>
      %161 = arith.mulf %159, %160 : vector<4x8x128xf32>
      %cst_60 = arith.constant 0.000000e+00 : f32
      %cst_61 = arith.constant 1.000000e+00 : f32
      %162 = vector.broadcast %cst_60 : f32 to vector<4x8x128xf32>
      %163 = arith.maximumf %162, %161 : vector<4x8x128xf32>
      %164 = vector.broadcast %cst_61 : f32 to vector<4x8x128xf32>
      %165 = arith.minimumf %164, %163 : vector<4x8x128xf32>
      %cst_62 = arith.constant 2.000000e+00 : f32
      %166 = vector.broadcast %cst_62 : f32 to vector<4x8x128xf32>
      %167 = arith.mulf %166, %165 : vector<4x8x128xf32>
      %168 = arith.subf %167, %137 : vector<4x8x128xf32>
      %cst_63 = arith.constant dense<0.000000e+00> : vector<4x128xf32>
      %169 = vector.multi_reduction <add>, %168, %cst_63 [1] : vector<4x8x128xf32> to vector<4x128xf32>
      %170 = vector.shape_cast %169 : vector<4x128xf32> to vector<4x1x128xf32>
      %cst_64 = arith.constant dense<0.000000e+00> : vector<8x128xf32>
      %171 = vector.multi_reduction <add>, %168, %cst_64 [0] : vector<4x8x128xf32> to vector<8x128xf32>
      %172 = vector.shape_cast %171 : vector<8x128xf32> to vector<1x8x128xf32>
      %cst_65 = arith.constant 6.250000e-02 : f32
      %173 = vector.broadcast %cst_65 : f32 to vector<4x1x128xf32>
      %174 = arith.mulf %173, %170 : vector<4x1x128xf32>
      %175 = arith.addf %148, %174 : vector<4x1x128xf32>
      %176 = arith.subf %175, %5 : vector<4x1x128xf32>
      %cst_66 = arith.constant 1.250000e-01 : f32
      %177 = vector.broadcast %cst_66 : f32 to vector<1x8x128xf32>
      %178 = arith.mulf %177, %172 : vector<1x8x128xf32>
      %179 = arith.addf %154, %178 : vector<1x8x128xf32>
      %180 = arith.subf %179, %8 : vector<1x8x128xf32>
      %cst_67 = arith.constant 0.000000e+00 : f32
      %181 = vector.broadcast %cst_67 : f32 to vector<1x8x128xf32>
      %182 = arith.maximumf %180, %181 : vector<1x8x128xf32>
      %183 = vector.broadcast %176 : vector<4x1x128xf32> to vector<4x8x128xf32>
      %184 = vector.broadcast %182 : vector<1x8x128xf32> to vector<4x8x128xf32>
      %185 = arith.addf %183, %184 : vector<4x8x128xf32>
      %186 = arith.subf %165, %185 : vector<4x8x128xf32>
      %187 = arith.addf %186, %2 : vector<4x8x128xf32>
      %cst_68 = arith.constant 0.999989986 : f32
      %188 = vector.broadcast %cst_68 : f32 to vector<4x8x128xf32>
      %189 = arith.mulf %187, %188 : vector<4x8x128xf32>
      %cst_69 = arith.constant 0.000000e+00 : f32
      %cst_70 = arith.constant 1.000000e+00 : f32
      %190 = vector.broadcast %cst_69 : f32 to vector<4x8x128xf32>
      %191 = arith.maximumf %190, %189 : vector<4x8x128xf32>
      %192 = vector.broadcast %cst_70 : f32 to vector<4x8x128xf32>
      %193 = arith.minimumf %192, %191 : vector<4x8x128xf32>
      %cst_71 = arith.constant 2.000000e+00 : f32
      %194 = vector.broadcast %cst_71 : f32 to vector<4x8x128xf32>
      %195 = arith.mulf %194, %193 : vector<4x8x128xf32>
      %196 = arith.subf %195, %165 : vector<4x8x128xf32>
      %cst_72 = arith.constant dense<0.000000e+00> : vector<4x128xf32>
      %197 = vector.multi_reduction <add>, %196, %cst_72 [1] : vector<4x8x128xf32> to vector<4x128xf32>
      %198 = vector.shape_cast %197 : vector<4x128xf32> to vector<4x1x128xf32>
      %cst_73 = arith.constant dense<0.000000e+00> : vector<8x128xf32>
      %199 = vector.multi_reduction <add>, %196, %cst_73 [0] : vector<4x8x128xf32> to vector<8x128xf32>
      %200 = vector.shape_cast %199 : vector<8x128xf32> to vector<1x8x128xf32>
      %cst_74 = arith.constant 6.250000e-02 : f32
      %201 = vector.broadcast %cst_74 : f32 to vector<4x1x128xf32>
      %202 = arith.mulf %201, %198 : vector<4x1x128xf32>
      %203 = arith.addf %176, %202 : vector<4x1x128xf32>
      %204 = arith.subf %203, %5 : vector<4x1x128xf32>
      %cst_75 = arith.constant 1.250000e-01 : f32
      %205 = vector.broadcast %cst_75 : f32 to vector<1x8x128xf32>
      %206 = arith.mulf %205, %200 : vector<1x8x128xf32>
      %207 = arith.addf %182, %206 : vector<1x8x128xf32>
      %208 = arith.subf %207, %8 : vector<1x8x128xf32>
      %cst_76 = arith.constant 0.000000e+00 : f32
      %209 = vector.broadcast %cst_76 : f32 to vector<1x8x128xf32>
      %210 = arith.maximumf %208, %209 : vector<1x8x128xf32>
      %211 = vector.broadcast %204 : vector<4x1x128xf32> to vector<4x8x128xf32>
      %212 = vector.broadcast %210 : vector<1x8x128xf32> to vector<4x8x128xf32>
      %213 = arith.addf %211, %212 : vector<4x8x128xf32>
      %214 = arith.subf %193, %213 : vector<4x8x128xf32>
      %215 = arith.addf %214, %2 : vector<4x8x128xf32>
      %cst_77 = arith.constant 0.999989986 : f32
      %216 = vector.broadcast %cst_77 : f32 to vector<4x8x128xf32>
      %217 = arith.mulf %215, %216 : vector<4x8x128xf32>
      %cst_78 = arith.constant 0.000000e+00 : f32
      %cst_79 = arith.constant 1.000000e+00 : f32
      %218 = vector.broadcast %cst_78 : f32 to vector<4x8x128xf32>
      %219 = arith.maximumf %218, %217 : vector<4x8x128xf32>
      %220 = vector.broadcast %cst_79 : f32 to vector<4x8x128xf32>
      %221 = arith.minimumf %220, %219 : vector<4x8x128xf32>
      %cst_80 = arith.constant 2.000000e+00 : f32
      %222 = vector.broadcast %cst_80 : f32 to vector<4x8x128xf32>
      %223 = arith.mulf %222, %221 : vector<4x8x128xf32>
      %224 = arith.subf %223, %193 : vector<4x8x128xf32>
      %cst_81 = arith.constant dense<0.000000e+00> : vector<4x128xf32>
      %225 = vector.multi_reduction <add>, %224, %cst_81 [1] : vector<4x8x128xf32> to vector<4x128xf32>
      %226 = vector.shape_cast %225 : vector<4x128xf32> to vector<4x1x128xf32>
      %cst_82 = arith.constant dense<0.000000e+00> : vector<8x128xf32>
      %227 = vector.multi_reduction <add>, %224, %cst_82 [0] : vector<4x8x128xf32> to vector<8x128xf32>
      %228 = vector.shape_cast %227 : vector<8x128xf32> to vector<1x8x128xf32>
      %cst_83 = arith.constant 6.250000e-02 : f32
      %229 = vector.broadcast %cst_83 : f32 to vector<4x1x128xf32>
      %230 = arith.mulf %229, %226 : vector<4x1x128xf32>
      %231 = arith.addf %204, %230 : vector<4x1x128xf32>
      %232 = arith.subf %231, %5 : vector<4x1x128xf32>
      %cst_84 = arith.constant 1.250000e-01 : f32
      %233 = vector.broadcast %cst_84 : f32 to vector<1x8x128xf32>
      %234 = arith.mulf %233, %228 : vector<1x8x128xf32>
      %235 = arith.addf %210, %234 : vector<1x8x128xf32>
      %236 = arith.subf %235, %8 : vector<1x8x128xf32>
      %cst_85 = arith.constant 0.000000e+00 : f32
      %237 = vector.broadcast %cst_85 : f32 to vector<1x8x128xf32>
      %238 = arith.maximumf %236, %237 : vector<1x8x128xf32>
      scf.yield %221, %232, %238 : vector<4x8x128xf32>, vector<4x1x128xf32>, vector<1x8x128xf32>
    }
    %c0_11 = arith.constant 0 : index
    %c0_12 = arith.constant 0 : index
    %c0_13 = arith.constant 0 : index
    %14 = vector.load %arg4[%c0_11, %c0_12, %c0_13] : memref<4x8x128xf32, #tpu.memory_space<vmem>>, vector<4x8x128xf32>
    tpu.vector_store %arg4[%c0_11, %c0_12, %c0_13], %13#0 {strides = array<i32>} : memref<4x8x128xf32, #tpu.memory_space<vmem>>, vector<4x8x128xf32>,
    return
  }
  func.func @transform_0(%arg0: i32) -> (i32, i32, i32) {
    %c0_i32 = arith.constant 0 : i32
    %c0_i32_0 = arith.constant 0 : i32
    %c0_i32_1 = arith.constant 0 : i32
    return %c0_i32, %c0_i32_0, %arg0 : i32, i32, i32
  }
  func.func @transform_1(%arg0: i32) -> (i32, i32, i32) {
    %c0_i32 = arith.constant 0 : i32
    %c0_i32_0 = arith.constant 0 : i32
    %c0_i32_1 = arith.constant 0 : i32
    %c0_i32_2 = arith.constant 0 : i32
    return %c0_i32, %c0_i32_0, %c0_i32_1 : i32, i32, i32
  }
  func.func @transform_2(%arg0: i32) -> (i32, i32, i32) {
    %c0_i32 = arith.constant 0 : i32
    %c0_i32_0 = arith.constant 0 : i32
    %c0_i32_1 = arith.constant 0 : i32
    %c0_i32_2 = arith.constant 0 : i32
    return %c0_i32, %c0_i32_0, %c0_i32_1 : i32, i32, i32
  }
  func.func @transform_3(%arg0: i32) -> (i32, i32, i32) {
    %c0_i32 = arith.constant 0 : i32
    %c0_i32_0 = arith.constant 0 : i32
    %c0_i32_1 = arith.constant 0 : i32
    return %c0_i32, %c0_i32_0, %arg0 : i32, i32, i32
  }
}

</mosaic_0001>

<bundles_post_ra>
// kernel: tpu_custom_call.1
= control target key start
LH: loop header
LB: loop body
LE: loop exit
PB: predicated region body
PF: predicated region fallthrough
CT: control target
= control target key end

     0   :  { %8 = vsyncpa [#allocation3], 0  ;;  %s1452_s0 = inlined_call_operand.hbm [shape: f32[4,8,128], index: 0, kind: input, shape index: {}]   ;;  %s1453_s1 = inlined_call_operand.vmem [shape: f32[4,1,1], index: 1, kind: input, shape index: {}]   ;;  %s1454_s2 = inlined_call_operand.vmem [shape: f32[1,8,1], index: 2, kind: input, shape index: {}]   ;;  %s1455_s3 = inlined_call_operand.hbm [shape: f32[4,8,128], index: 3, kind: output, shape index: {}]  }
   0x1   :  { %9 = vsyncpa [#allocation4], 0  ;;  %s962_s12 = smov [#allocation2]  }
   0x2   :  { %s15_s13 = sshll.u32 %s962_s12, 4  ;;  %s16_s13 = int_to_ptr.vmem [resolvable:$true] %s15_s13 }
   0x3   :  { %s846_s14 = scalar_lea.vmem %s16_s13, 512  ;;  %p851_p1 = scmp.lt.s32.totalorder %s16_s13, %s16_s13 }
   0x4   :  { %p847_p0 = scmp.ne.s32.totalorder %s16_s13, %s846_s14  ;;  %p852_p2 = scmp.lt.s32.totalorder %s846_s14, %s846_s14 }
   0x6   :  { %p853_p3 = por %p852_p2, %p851_p1 }
   0x8   :  { %p854_p4 = pnand %p853_p3, %p847_p0 }
   0xa   :  { %857 = shalt.err (!%p854_p4)
}
   0xb   :  { %s963_s15 = smov 128   ;;  %s964_s16 = smov 8  }
   0xc   :  { %21 = dma.hbm_to_vmem [thread:$0]  %s1452_s0, 512, %s16_s13, [#allocation3], %s963_s15, %s963_s15, %s964_s16  }
   0xd   :  { %918 = dma.done.wait [#allocation3], 512  }
   0xe   :  { %919 = vsyncadd [#allocation3], 4294966784  ;;  %v965_v0 = vmov 0   ;;  %v29_v1 = vld [vmem:[#allocation2] sm:$0xff]  ;;  %v30_v2 = vld [vmem:[#allocation2 + $0x8] sm:$0xff]  ;;  %v46_v14 = vlaneseq  ;;  %v1026_v26 = vmov 0.0  }
   0xf   :  { %837 = vset.pattern.permute.xlu1 %v965_v0  ;;  %836 = vset.pattern.permute.xlu0 %v965_v0  ;;  %v31_v3 = vld [vmem:[#allocation2 + $0x10] sm:$0xff]  ;;  %v32_v4 = vld [vmem:[#allocation2 + $0x18] sm:$0xff]  ;;  %v993_v5 = vmul.f32 0.5, %v29_v1  ;;  %v995_v6 = vmul.f32 0.5, %v30_v2  ;;  %v39_v8 = vld [vmem:[%s1453_s1 + $0x2] sm:$0x1] }
  0x10   :  { %v997_v7 = vmul.f32 0.5, %v31_v3  ;;  %v1002_v9 = vmul.f32 0.5, %v32_v4  ;;  %61 = vperm.xlu1 %837, %v39_v8   ;;  %v37_v10 = vld [vmem:[%s1453_s1] sm:$0x1]  ;;  %v40_v11 = vld [vmem:[%s1453_s1 + $0x3] sm:$0x1] }
  0x11   :  { %43 = vperm.xlu0 %836, %v37_v10   ;;  %v38_v12 = vld [vmem:[%s1453_s1 + $0x1] sm:$0x1]  ;;  %v47_v15 = vshrl.u32 %v46_v14, 7  ;;  %v1028_v27 = vmov 0.0   ;;  %v1030_v28 = vmov 0.0   ;;  %v1032_v29 = vmov 0.0  }
  0x12   :  { %v77_v13 = vld [vmem:[%s1454_s2] sm:$0xff]  ;;  %v1034_v30 = vmov 0.0   ;;  %v1036_v31 = vmov 0.0   ;;  %v1038_v32 = vmov 0.0   ;;  %v1040_v33 = vmov 0.0   ;;  %s1044_s1 = smov 0  }
  0x13   :  { %v48_v16 = vsub.s32 0, %v47_v15  ;;  %v1042_v34 = vmov 0.0  }
  0x14   :  { %70 = vperm.xlu1 %837, %v40_v11  }
  0x15   :  { %52 = vperm.xlu0 %836, %v38_v12  }
  0x19   :  { %80 = vperm.xlu0 %836, %v77_v13  }
  0x8b   :  { %v62_v17 = vpop.permute.xlu1 %61 }
  0x8c   :  { %v1016_v18 = vrot.slane %v62_v17, %v48_v16  ;;  %v44_v19 = vpop.permute.xlu0 %43 }
  0x8d   :  { %v1018_v20 = vrot.slane %v44_v19, %v48_v16 }
  0x8f   :  { %v71_v21 = vpop.permute.xlu1 %70 }
  0x90   :  { %v1020_v22 = vrot.slane %v71_v21, %v48_v16  ;;  %v53_v23 = vpop.permute.xlu0 %52 }
  0x91   :  { %v1022_v24 = vrot.slane %v53_v23, %v48_v16 }
  0x94   :  { %v1024_v25 = vpop.permute.xlu0 %80 }
  0x95 LB: > { %v98_v35 = vadd.f32 %v924_v26, %v940_v30  ;;  %v99_v36 = vadd.f32 %v924_v26, %v936_v29  ;;  %v100_v37 = vadd.f32 %v924_v26, %v932_v28  ;;  %v101_v38 = vadd.f32 %v924_v26, %v928_v27  ;;  %s88_s1 = sadd.s32 1, %s960_s1   ;;  %s960_s1 = sphi %s1044_s1, %s88_s1   ;;  %v956_v34 = vphi %v1042_v34, %v1463_v34   ;;  %v952_v33 = vphi %v1040_v33, %v1462_v33   ;;  %v948_v32 = vphi %v1038_v32, %v1461_v32   ;;  %v944_v31 = vphi %v1036_v31, %v1460_v31   ;;  %v940_v30 = vphi %v1034_v30, %v690_v30   ;;  %v936_v29 = vphi %v1032_v29, %v691_v29   ;;  %v932_v28 = vphi %v1030_v28, %v692_v28   ;;  %v928_v27 = vphi %v1028_v27, %v693_v27   ;;  %v924_v26 = vphi %v1026_v26, %v697_v26  }
  0x96   : > { %p85_p5 = scmp.ge.s32.totalorder %s88_s1, 128  }
  0x97   : > { %v102_v39 = vsub.f32 %v956_v34, %v98_v35  ;;  %v103_v40 = vsub.f32 %v952_v33, %v99_v36  ;;  %v104_v41 = vsub.f32 %v948_v32, %v100_v37  ;;  %v105_v42 = vsub.f32 %v944_v31, %v101_v38  ;;  %s966_s2 = smov (%p85_p5), [#allocation5]  }
  0x98   :  { %s707_s28 = sshll.u32 (%p85_p5), %s966_s2, 4  ;;  %s708_s28 = int_to_ptr.vmem [resolvable:$true] %s707_s28 }
  0x99   : > { %v106_v43 = vadd.f32 %v102_v39, %v993_v5  ;;  %v107_v44 = vadd.f32 %v103_v40, %v995_v6  ;;  %v108_v45 = vadd.f32 %v104_v41, %v997_v7  ;;  %v109_v46 = vadd.f32 %v105_v42, %v1002_v9  ;;  %s858_s29 = scalar_lea.vmem (%p85_p5), %s708_s28, 512  ;;  %p863_p7 = scmp.lt.s32.totalorder (%p85_p5), %s708_s28, %s708_s28 }
  0x9a   :  { %p859_p6 = scmp.ne.s32.totalorder (%p85_p5), %s708_s28, %s858_s29  ;;  %p864_p8 = scmp.lt.s32.totalorder (%p85_p5), %s858_s29, %s858_s29 }
  0x9b   : > { %v110_v47 = vmul.f32 0.99999, %v106_v43  ;;  %v111_v48 = vmul.f32 0.99999, %v107_v44  ;;  %v112_v49 = vmul.f32 0.99999, %v108_v45 }
  0x9c   : > { %v113_v50 = vmul.f32 0.99999, %v109_v46  ;;  %p865_p9 = por (%p85_p5), %p864_p8, %p863_p7 }
  0x9d   : > { %v114_v51 = vmax.f32 %v110_v47, 0.0  ;;  %v115_v52 = vmax.f32 %v111_v48, 0.0  ;;  %v116_v53 = vmax.f32 %v112_v49, 0.0 }
  0x9e   : > { %v117_v54 = vmax.f32 %v113_v50, 0.0  ;;  %p866_p10 = pnand (%p85_p5), %p865_p9, %p859_p6 }
  0x9f   : > { %v1080_v55 = vmin.f32 %v114_v51, 1.0  ;;  %v1082_v56 = vmin.f32 %v115_v52, 1.0  ;;  %v1084_v57 = vmin.f32 %v116_v53, 1.0 }
  0xa0   : > { %v1086_v58 = vmin.f32 %v117_v54, 1.0 }
  0xa1   : > { %v122_v59 = vmul.f32 2.0, %v1080_v55  ;;  %v123_v60 = vmul.f32 2.0, %v1082_v56  ;;  %v124_v61 = vmul.f32 2.0, %v1084_v57 }
  0xa2   : > { %v125_v62 = vmul.f32 2.0, %v1086_v58 }
  0xa3   : > { %v126_v63 = vsub.f32 %v122_v59, %v956_v34  ;;  %v127_v0 = vsub.f32 %v123_v60, %v952_v33  ;;  %v128_v1 = vsub.f32 %v124_v61, %v948_v32 }
  0xa4   : > { %v129_v2 = vsub.f32 %v125_v62, %v944_v31 }
  0xa5   : > { %v130_v3 = vrot.slane %v126_v63, 4  ;;  %v136_v4 = vrot.slane %v127_v0, 4  ;;  %v142_v8 = vrot.slane %v128_v1, 4  ;;  %v154_v10 = vadd.f32 %v127_v0, %v126_v63 }
  0xa6   : > { %v148_v11 = vrot.slane %v129_v2, 4 }
  0xa7   : > { %v131_v12 = vadd.f32 %v130_v3, %v126_v63  ;;  %v137_v13 = vadd.f32 %v136_v4, %v127_v0  ;;  %v143_v14 = vadd.f32 %v142_v8, %v128_v1  ;;  %v155_v15 = vadd.f32 %v154_v10, %v128_v1 }
  0xa8   : > { %v149_v16 = vadd.f32 %v148_v11, %v129_v2 }
  0xa9   : > { %v132_v17 = vrot.slane %v131_v12, 2  ;;  %v138_v19 = vrot.slane %v137_v13, 2  ;;  %v144_v21 = vrot.slane %v143_v14, 2  ;;  %v156_v23 = vadd.f32 %v155_v15, %v129_v2 }
  0xaa   : > { %v150_v35 = vrot.slane %v149_v16, 2 }
  0xab   : > { %v133_v36 = vadd.f32 %v132_v17, %v131_v12  ;;  %v139_v34 = vadd.f32 %v138_v19, %v137_v13  ;;  %v145_v33 = vadd.f32 %v144_v21, %v143_v14  ;;  %v169_v32 = vmul.f32 0.125, %v156_v23 }
  0xac   : > { %v151_v31 = vadd.f32 %v150_v35, %v149_v16 }
  0xad   : > { %v134_v37 = vrot.slane %v133_v36, 1  ;;  %v140_v38 = vrot.slane %v139_v34, 1  ;;  %v146_v39 = vrot.slane %v145_v33, 1  ;;  %v170_v40 = vadd.f32 %v924_v26, %v169_v32 }
  0xae   : > { %v152_v41 = vrot.slane %v151_v31, 1 }
  0xaf   : > { %v135_v42 = vadd.f32 %v134_v37, %v133_v36  ;;  %v141_v43 = vadd.f32 %v140_v38, %v139_v34  ;;  %v147_v44 = vadd.f32 %v146_v39, %v145_v33  ;;  %v171_v45 = vsub.f32 %v170_v40, %v1024_v25 }
  0xb0   : > { %v153_v46 = vadd.f32 %v152_v41, %v151_v31 }
  0xb1   : > { %v157_v47 = vmul.f32 0.0625, %v135_v42  ;;  %v158_v48 = vmul.f32 0.0625, %v141_v43  ;;  %v159_v49 = vmul.f32 0.0625, %v147_v44  ;;  %v172_v54 = vmax.f32 %v171_v45, 0.0 }
  0xb2   : > { %v160_v50 = vmul.f32 0.0625, %v153_v46 }
  0xb3   : > { %v161_v51 = vadd.f32 %v940_v30, %v157_v47  ;;  %v162_v52 = vadd.f32 %v936_v29, %v158_v48  ;;  %v163_v53 = vadd.f32 %v932_v28, %v159_v49 }
  0xb4   : > { %v164_v26 = vadd.f32 %v928_v27, %v160_v50 }
  0xb5   : > { %v1099_v59 = vsub.f32 %v161_v51, %v1018_v20  ;;  %v1102_v60 = vsub.f32 %v162_v52, %v1022_v24  ;;  %v1105_v61 = vsub.f32 %v163_v53, %v1016_v18 }
  0xb6   : > { %v1108_v62 = vsub.f32 %v164_v26, %v1020_v22 }
  0xb7   : > { %v173_v30 = vadd.f32 %v172_v54, %v1099_v59  ;;  %v174_v29 = vadd.f32 %v172_v54, %v1102_v60  ;;  %v175_v28 = vadd.f32 %v172_v54, %v1105_v61 }
  0xb8   : > { %v176_v27 = vadd.f32 %v172_v54, %v1108_v62 }
  0xb9   : > { %v177_v63 = vsub.f32 %v1080_v55, %v173_v30  ;;  %v178_v0 = vsub.f32 %v1082_v56, %v174_v29  ;;  %v179_v1 = vsub.f32 %v1084_v57, %v175_v28 }
  0xba   : > { %v180_v2 = vsub.f32 %v1086_v58, %v176_v27 }
  0xbb   : > { %v181_v3 = vadd.f32 %v177_v63, %v993_v5  ;;  %v182_v4 = vadd.f32 %v178_v0, %v995_v6  ;;  %v183_v8 = vadd.f32 %v179_v1, %v997_v7 }
  0xbc   : > { %v184_v10 = vadd.f32 %v180_v2, %v1002_v9 }
  0xbd   : > { %v185_v11 = vmul.f32 0.99999, %v181_v3  ;;  %v186_v12 = vmul.f32 0.99999, %v182_v4  ;;  %v187_v13 = vmul.f32 0.99999, %v183_v8 }
  0xbe   : > { %v188_v14 = vmul.f32 0.99999, %v184_v10 }
  0xbf   : > { %v189_v15 = vmax.f32 %v185_v11, 0.0  ;;  %v190_v16 = vmax.f32 %v186_v12, 0.0  ;;  %v191_v17 = vmax.f32 %v187_v13, 0.0 }
  0xc0   : > { %v192_v19 = vmax.f32 %v188_v14, 0.0 }
  0xc1   : > { %v1122_v21 = vmin.f32 %v189_v15, 1.0  ;;  %v1124_v23 = vmin.f32 %v190_v16, 1.0  ;;  %v1126_v35 = vmin.f32 %v191_v17, 1.0 }
  0xc2   : > { %v1128_v36 = vmin.f32 %v192_v19, 1.0 }
  0xc3   : > { %v197_v34 = vmul.f32 2.0, %v1122_v21  ;;  %v198_v33 = vmul.f32 2.0, %v1124_v23  ;;  %v199_v32 = vmul.f32 2.0, %v1126_v35 }
  0xc4   : > { %v200_v31 = vmul.f32 2.0, %v1128_v36 }
  0xc5   : > { %v201_v37 = vsub.f32 %v197_v34, %v1080_v55  ;;  %v202_v38 = vsub.f32 %v198_v33, %v1082_v56  ;;  %v203_v39 = vsub.f32 %v199_v32, %v1084_v57 }
  0xc6   : > { %v204_v40 = vsub.f32 %v200_v31, %v1086_v58 }
  0xc7   : > { %v205_v41 = vrot.slane %v201_v37, 4  ;;  %v211_v42 = vrot.slane %v202_v38, 4  ;;  %v217_v43 = vrot.slane %v203_v39, 4  ;;  %v229_v44 = vadd.f32 %v202_v38, %v201_v37 }
  0xc8   : > { %v223_v45 = vrot.slane %v204_v40, 4 }
  0xc9   : > { %v206_v46 = vadd.f32 %v205_v41, %v201_v37  ;;  %v212_v47 = vadd.f32 %v211_v42, %v202_v38  ;;  %v218_v48 = vadd.f32 %v217_v43, %v203_v39  ;;  %v230_v49 = vadd.f32 %v229_v44, %v203_v39 }
  0xca   : > { %v224_v50 = vadd.f32 %v223_v45, %v204_v40 }
  0xcb   : > { %v207_v51 = vrot.slane %v206_v46, 2  ;;  %v213_v52 = vrot.slane %v212_v47, 2  ;;  %v219_v53 = vrot.slane %v218_v48, 2  ;;  %v231_v55 = vadd.f32 %v230_v49, %v204_v40 }
  0xcc   : > { %v225_v26 = vrot.slane %v224_v50, 2 }
  0xcd   : > { %v208_v56 = vadd.f32 %v207_v51, %v206_v46  ;;  %v214_v30 = vadd.f32 %v213_v52, %v212_v47  ;;  %v220_v57 = vadd.f32 %v219_v53, %v218_v48  ;;  %v244_v29 = vmul.f32 0.125, %v231_v55 }
  0xce   : > { %v226_v58 = vadd.f32 %v225_v26, %v224_v50 }
  0xcf   : > { %v209_v28 = vrot.slane %v208_v56, 1  ;;  %v215_v27 = vrot.slane %v214_v30, 1  ;;  %v221_v63 = vrot.slane %v220_v57, 1  ;;  %v245_v0 = vadd.f32 %v244_v29, %v172_v54 }
  0xd0   : > { %v227_v1 = vrot.slane %v226_v58, 1 }
  0xd1   : > { %v210_v2 = vadd.f32 %v209_v28, %v208_v56  ;;  %v216_v3 = vadd.f32 %v215_v27, %v214_v30  ;;  %v222_v4 = vadd.f32 %v221_v63, %v220_v57  ;;  %v246_v8 = vsub.f32 %v245_v0, %v1024_v25 }
  0xd2   : > { %v228_v10 = vadd.f32 %v227_v1, %v226_v58 }
  0xd3   : > { %v232_v11 = vmul.f32 0.0625, %v210_v2  ;;  %v233_v12 = vmul.f32 0.0625, %v216_v3  ;;  %v234_v13 = vmul.f32 0.0625, %v222_v4  ;;  %v247_v19 = vmax.f32 %v246_v8, 0.0 }
  0xd4   : > { %v235_v14 = vmul.f32 0.0625, %v228_v10 }
  0xd5   : > { %v236_v15 = vadd.f32 %v232_v11, %v1099_v59  ;;  %v237_v16 = vadd.f32 %v233_v12, %v1102_v60  ;;  %v238_v17 = vadd.f32 %v234_v13, %v1105_v61 }
  0xd6   : > { %v239_v54 = vadd.f32 %v235_v14, %v1108_v62 }
  0xd7   : > { %v1144_v34 = vsub.f32 %v236_v15, %v1018_v20  ;;  %v1147_v33 = vsub.f32 %v237_v16, %v1022_v24  ;;  %v1150_v32 = vsub.f32 %v238_v17, %v1016_v18 }
  0xd8   : > { %v1153_v31 = vsub.f32 %v239_v54, %v1020_v22 }
  0xd9   : > { %v248_v59 = vadd.f32 %v247_v19, %v1144_v34  ;;  %v249_v60 = vadd.f32 %v247_v19, %v1147_v33  ;;  %v250_v61 = vadd.f32 %v247_v19, %v1150_v32 }
  0xda   : > { %v251_v62 = vadd.f32 %v247_v19, %v1153_v31 }
  0xdb   : > { %v252_v37 = vsub.f32 %v1122_v21, %v248_v59  ;;  %v253_v38 = vsub.f32 %v1124_v23, %v249_v60  ;;  %v254_v39 = vsub.f32 %v1126_v35, %v250_v61 }
  0xdc   : > { %v255_v40 = vsub.f32 %v1128_v36, %v251_v62 }
  0xdd   : > { %v256_v41 = vadd.f32 %v252_v37, %v993_v5  ;;  %v257_v42 = vadd.f32 %v253_v38, %v995_v6  ;;  %v258_v43 = vadd.f32 %v254_v39, %v997_v7 }
  0xde   : > { %v259_v44 = vadd.f32 %v255_v40, %v1002_v9 }
  0xdf   : > { %v260_v45 = vmul.f32 0.99999, %v256_v41  ;;  %v261_v46 = vmul.f32 0.99999, %v257_v42  ;;  %v262_v47 = vmul.f32 0.99999, %v258_v43 }
  0xe0   : > { %v263_v48 = vmul.f32 0.99999, %v259_v44 }
  0xe1   : > { %v264_v49 = vmax.f32 %v260_v45, 0.0  ;;  %v265_v50 = vmax.f32 %v261_v46, 0.0  ;;  %v266_v51 = vmax.f32 %v262_v47, 0.0 }
  0xe2   : > { %v267_v52 = vmax.f32 %v263_v48, 0.0 }
  0xe3   : > { %v1167_v53 = vmin.f32 %v264_v49, 1.0  ;;  %v1169_v55 = vmin.f32 %v265_v50, 1.0  ;;  %v1171_v26 = vmin.f32 %v266_v51, 1.0 }
  0xe4   : > { %v1173_v56 = vmin.f32 %v267_v52, 1.0 }
  0xe5   : > { %v272_v30 = vmul.f32 2.0, %v1167_v53  ;;  %v273_v57 = vmul.f32 2.0, %v1169_v55  ;;  %v274_v29 = vmul.f32 2.0, %v1171_v26 }
  0xe6   : > { %v275_v58 = vmul.f32 2.0, %v1173_v56 }
  0xe7   : > { %v276_v28 = vsub.f32 %v272_v30, %v1122_v21  ;;  %v277_v27 = vsub.f32 %v273_v57, %v1124_v23  ;;  %v278_v63 = vsub.f32 %v274_v29, %v1126_v35 }
  0xe8   : > { %v279_v0 = vsub.f32 %v275_v58, %v1128_v36 }
  0xe9   : > { %v280_v1 = vrot.slane %v276_v28, 4  ;;  %v286_v2 = vrot.slane %v277_v27, 4  ;;  %v292_v3 = vrot.slane %v278_v63, 4  ;;  %v304_v4 = vadd.f32 %v277_v27, %v276_v28 }
  0xea   : > { %v298_v8 = vrot.slane %v279_v0, 4 }
  0xeb   : > { %v281_v10 = vadd.f32 %v280_v1, %v276_v28  ;;  %v287_v11 = vadd.f32 %v286_v2, %v277_v27  ;;  %v293_v12 = vadd.f32 %v292_v3, %v278_v63  ;;  %v305_v13 = vadd.f32 %v304_v4, %v278_v63 }
  0xec   : > { %v299_v14 = vadd.f32 %v298_v8, %v279_v0 }
  0xed   : > { %v282_v15 = vrot.slane %v281_v10, 2  ;;  %v288_v16 = vrot.slane %v287_v11, 2  ;;  %v294_v17 = vrot.slane %v293_v12, 2  ;;  %v306_v21 = vadd.f32 %v305_v13, %v279_v0 }
  0xee   : > { %v300_v54 = vrot.slane %v299_v14, 2 }
  0xef   : > { %v283_v23 = vadd.f32 %v282_v15, %v281_v10  ;;  %v289_v59 = vadd.f32 %v288_v16, %v287_v11  ;;  %v295_v35 = vadd.f32 %v294_v17, %v293_v12  ;;  %v319_v60 = vmul.f32 0.125, %v306_v21 }
  0xf0   : > { %v301_v36 = vadd.f32 %v300_v54, %v299_v14 }
  0xf1   : > { %v284_v61 = vrot.slane %v283_v23, 1  ;;  %v290_v62 = vrot.slane %v289_v59, 1  ;;  %v296_v37 = vrot.slane %v295_v35, 1  ;;  %v320_v38 = vadd.f32 %v319_v60, %v247_v19 }
  0xf2   : > { %v302_v39 = vrot.slane %v301_v36, 1 }
  0xf3   : > { %v285_v40 = vadd.f32 %v284_v61, %v283_v23  ;;  %v291_v41 = vadd.f32 %v290_v62, %v289_v59  ;;  %v297_v42 = vadd.f32 %v296_v37, %v295_v35  ;;  %v321_v43 = vsub.f32 %v320_v38, %v1024_v25 }
  0xf4   : > { %v303_v44 = vadd.f32 %v302_v39, %v301_v36 }
  0xf5   : > { %v307_v45 = vmul.f32 0.0625, %v285_v40  ;;  %v308_v46 = vmul.f32 0.0625, %v291_v41  ;;  %v309_v47 = vmul.f32 0.0625, %v297_v42  ;;  %v322_v52 = vmax.f32 %v321_v43, 0.0 }
  0xf6   : > { %v310_v48 = vmul.f32 0.0625, %v303_v44 }
  0xf7   : > { %v311_v49 = vadd.f32 %v307_v45, %v1144_v34  ;;  %v312_v50 = vadd.f32 %v308_v46, %v1147_v33  ;;  %v313_v51 = vadd.f32 %v309_v47, %v1150_v32 }
  0xf8   : > { %v314_v19 = vadd.f32 %v310_v48, %v1153_v31 }
  0xf9   : > { %v1189_v30 = vsub.f32 %v311_v49, %v1018_v20  ;;  %v1192_v57 = vsub.f32 %v312_v50, %v1022_v24  ;;  %v1195_v29 = vsub.f32 %v313_v51, %v1016_v18 }
  0xfa   : > { %v1198_v58 = vsub.f32 %v314_v19, %v1020_v22 }
  0xfb   : > { %v323_v34 = vadd.f32 %v322_v52, %v1189_v30  ;;  %v324_v33 = vadd.f32 %v322_v52, %v1192_v57  ;;  %v325_v32 = vadd.f32 %v322_v52, %v1195_v29 }
  0xfc   : > { %v326_v31 = vadd.f32 %v322_v52, %v1198_v58 }
  0xfd   : > { %v327_v28 = vsub.f32 %v1167_v53, %v323_v34  ;;  %v328_v27 = vsub.f32 %v1169_v55, %v324_v33  ;;  %v329_v63 = vsub.f32 %v1171_v26, %v325_v32 }
  0xfe   : > { %v330_v0 = vsub.f32 %v1173_v56, %v326_v31 }
  0xff   : > { %v331_v1 = vadd.f32 %v327_v28, %v993_v5  ;;  %v332_v2 = vadd.f32 %v328_v27, %v995_v6  ;;  %v333_v3 = vadd.f32 %v329_v63, %v997_v7 }
 0x100   : > { %v334_v4 = vadd.f32 %v330_v0, %v1002_v9 }
 0x101   : > { %v335_v8 = vmul.f32 0.99999, %v331_v1  ;;  %v336_v10 = vmul.f32 0.99999, %v332_v2  ;;  %v337_v11 = vmul.f32 0.99999, %v333_v3 }
 0x102   : > { %v338_v12 = vmul.f32 0.99999, %v334_v4 }
 0x103   : > { %v339_v13 = vmax.f32 %v335_v8, 0.0  ;;  %v340_v14 = vmax.f32 %v336_v10, 0.0  ;;  %v341_v15 = vmax.f32 %v337_v11, 0.0 }
 0x104   : > { %v342_v16 = vmax.f32 %v338_v12, 0.0 }
 0x105   : > { %v1212_v17 = vmin.f32 %v339_v13, 1.0  ;;  %v1214_v21 = vmin.f32 %v340_v14, 1.0  ;;  %v1216_v54 = vmin.f32 %v341_v15, 1.0 }
 0x106   : > { %v1218_v23 = vmin.f32 %v342_v16, 1.0 }
 0x107   : > { %v347_v59 = vmul.f32 2.0, %v1212_v17  ;;  %v348_v35 = vmul.f32 2.0, %v1214_v21  ;;  %v349_v60 = vmul.f32 2.0, %v1216_v54 }
 0x108   : > { %v350_v36 = vmul.f32 2.0, %v1218_v23 }
 0x109   : > { %v351_v61 = vsub.f32 %v347_v59, %v1167_v53  ;;  %v352_v62 = vsub.f32 %v348_v35, %v1169_v55  ;;  %v353_v37 = vsub.f32 %v349_v60, %v1171_v26 }
 0x10a   : > { %v354_v38 = vsub.f32 %v350_v36, %v1173_v56 }
 0x10b   : > { %v355_v39 = vrot.slane %v351_v61, 4  ;;  %v361_v40 = vrot.slane %v352_v62, 4  ;;  %v367_v41 = vrot.slane %v353_v37, 4  ;;  %v379_v42 = vadd.f32 %v352_v62, %v351_v61 }
 0x10c   : > { %v373_v43 = vrot.slane %v354_v38, 4 }
 0x10d   : > { %v356_v44 = vadd.f32 %v355_v39, %v351_v61  ;;  %v362_v45 = vadd.f32 %v361_v40, %v352_v62  ;;  %v368_v46 = vadd.f32 %v367_v41, %v353_v37  ;;  %v380_v47 = vadd.f32 %v379_v42, %v353_v37 }
 0x10e   : > { %v374_v48 = vadd.f32 %v373_v43, %v354_v38 }
 0x10f   : > { %v357_v49 = vrot.slane %v356_v44, 2  ;;  %v363_v50 = vrot.slane %v362_v45, 2  ;;  %v369_v51 = vrot.slane %v368_v46, 2  ;;  %v381_v53 = vadd.f32 %v380_v47, %v354_v38 }
 0x110   : > { %v375_v19 = vrot.slane %v374_v48, 2 }
 0x111   : > { %v358_v55 = vadd.f32 %v357_v49, %v356_v44  ;;  %v364_v34 = vadd.f32 %v363_v50, %v362_v45  ;;  %v370_v26 = vadd.f32 %v369_v51, %v368_v46  ;;  %v394_v33 = vmul.f32 0.125, %v381_v53 }
 0x112   : > { %v376_v56 = vadd.f32 %v375_v19, %v374_v48 }
 0x113   : > { %v359_v32 = vrot.slane %v358_v55, 1  ;;  %v365_v31 = vrot.slane %v364_v34, 1  ;;  %v371_v28 = vrot.slane %v370_v26, 1  ;;  %v395_v27 = vadd.f32 %v394_v33, %v322_v52 }
 0x114   : > { %v377_v63 = vrot.slane %v376_v56, 1 }
 0x115   : > { %v360_v0 = vadd.f32 %v359_v32, %v358_v55  ;;  %v366_v1 = vadd.f32 %v365_v31, %v364_v34  ;;  %v372_v2 = vadd.f32 %v371_v28, %v370_v26  ;;  %v396_v3 = vsub.f32 %v395_v27, %v1024_v25 }
 0x116   : > { %v378_v4 = vadd.f32 %v377_v63, %v376_v56 }
 0x117   : > { %v382_v8 = vmul.f32 0.0625, %v360_v0  ;;  %v383_v10 = vmul.f32 0.0625, %v366_v1  ;;  %v384_v11 = vmul.f32 0.0625, %v372_v2  ;;  %v397_v16 = vmax.f32 %v396_v3, 0.0 }
 0x118   : > { %v385_v12 = vmul.f32 0.0625, %v378_v4 }
 0x119   : > { %v386_v13 = vadd.f32 %v382_v8, %v1189_v30  ;;  %v387_v14 = vadd.f32 %v383_v10, %v1192_v57  ;;  %v388_v15 = vadd.f32 %v384_v11, %v1195_v29 }
 0x11a   : > { %v389_v52 = vadd.f32 %v385_v12, %v1198_v58 }
 0x11b   : > { %v1234_v59 = vsub.f32 %v386_v13, %v1018_v20  ;;  %v1237_v35 = vsub.f32 %v387_v14, %v1022_v24  ;;  %v1240_v60 = vsub.f32 %v388_v15, %v1016_v18 }
 0x11c   : > { %v1243_v36 = vsub.f32 %v389_v52, %v1020_v22 }
 0x11d   : > { %v398_v30 = vadd.f32 %v397_v16, %v1234_v59  ;;  %v399_v57 = vadd.f32 %v397_v16, %v1237_v35  ;;  %v400_v29 = vadd.f32 %v397_v16, %v1240_v60 }
 0x11e   : > { %v401_v58 = vadd.f32 %v397_v16, %v1243_v36 }
 0x11f   : > { %v402_v61 = vsub.f32 %v1212_v17, %v398_v30  ;;  %v403_v62 = vsub.f32 %v1214_v21, %v399_v57  ;;  %v404_v37 = vsub.f32 %v1216_v54, %v400_v29 }
 0x120   : > { %v405_v38 = vsub.f32 %v1218_v23, %v401_v58 }
 0x121   : > { %v406_v39 = vadd.f32 %v402_v61, %v993_v5  ;;  %v407_v40 = vadd.f32 %v403_v62, %v995_v6  ;;  %v408_v41 = vadd.f32 %v404_v37, %v997_v7 }
 0x122   : > { %v409_v42 = vadd.f32 %v405_v38, %v1002_v9 }
 0x123   : > { %v410_v43 = vmul.f32 0.99999, %v406_v39  ;;  %v411_v44 = vmul.f32 0.99999, %v407_v40  ;;  %v412_v45 = vmul.f32 0.99999, %v408_v41 }
 0x124   : > { %v413_v46 = vmul.f32 0.99999, %v409_v42 }
 0x125   : > { %v414_v47 = vmax.f32 %v410_v43, 0.0  ;;  %v415_v48 = vmax.f32 %v411_v44, 0.0  ;;  %v416_v49 = vmax.f32 %v412_v45, 0.0 }
 0x126   : > { %v417_v50 = vmax.f32 %v413_v46, 0.0 }
 0x127   : > { %v1257_v51 = vmin.f32 %v414_v47, 1.0  ;;  %v1259_v53 = vmin.f32 %v415_v48, 1.0  ;;  %v1261_v19 = vmin.f32 %v416_v49, 1.0 }
 0x128   : > { %v1263_v55 = vmin.f32 %v417_v50, 1.0 }
 0x129   : > { %v422_v34 = vmul.f32 2.0, %v1257_v51  ;;  %v423_v26 = vmul.f32 2.0, %v1259_v53  ;;  %v424_v33 = vmul.f32 2.0, %v1261_v19 }
 0x12a   : > { %v425_v56 = vmul.f32 2.0, %v1263_v55 }
 0x12b   : > { %v426_v32 = vsub.f32 %v422_v34, %v1212_v17  ;;  %v427_v31 = vsub.f32 %v423_v26, %v1214_v21  ;;  %v428_v28 = vsub.f32 %v424_v33, %v1216_v54 }
 0x12c   : > { %v429_v27 = vsub.f32 %v425_v56, %v1218_v23 }
 0x12d   : > { %v430_v63 = vrot.slane %v426_v32, 4  ;;  %v436_v0 = vrot.slane %v427_v31, 4  ;;  %v442_v1 = vrot.slane %v428_v28, 4  ;;  %v454_v2 = vadd.f32 %v427_v31, %v426_v32 }
 0x12e   : > { %v448_v3 = vrot.slane %v429_v27, 4 }
 0x12f   : > { %v431_v4 = vadd.f32 %v430_v63, %v426_v32  ;;  %v437_v8 = vadd.f32 %v436_v0, %v427_v31  ;;  %v443_v10 = vadd.f32 %v442_v1, %v428_v28  ;;  %v455_v11 = vadd.f32 %v454_v2, %v428_v28 }
 0x130   : > { %v449_v12 = vadd.f32 %v448_v3, %v429_v27 }
 0x131   : > { %v432_v13 = vrot.slane %v431_v4, 2  ;;  %v438_v14 = vrot.slane %v437_v8, 2  ;;  %v444_v15 = vrot.slane %v443_v10, 2  ;;  %v456_v17 = vadd.f32 %v455_v11, %v429_v27 }
 0x132   : > { %v450_v52 = vrot.slane %v449_v12, 2 }
 0x133   : > { %v433_v21 = vadd.f32 %v432_v13, %v431_v4  ;;  %v439_v30 = vadd.f32 %v438_v14, %v437_v8  ;;  %v445_v54 = vadd.f32 %v444_v15, %v443_v10  ;;  %v469_v57 = vmul.f32 0.125, %v456_v17 }
 0x134   : > { %v451_v23 = vadd.f32 %v450_v52, %v449_v12 }
 0x135   : > { %v434_v29 = vrot.slane %v433_v21, 1  ;;  %v440_v58 = vrot.slane %v439_v30, 1  ;;  %v446_v61 = vrot.slane %v445_v54, 1  ;;  %v470_v62 = vadd.f32 %v469_v57, %v397_v16 }
 0x136   : > { %v452_v37 = vrot.slane %v451_v23, 1 }
 0x137   : > { %v435_v38 = vadd.f32 %v434_v29, %v433_v21  ;;  %v441_v39 = vadd.f32 %v440_v58, %v439_v30  ;;  %v447_v40 = vadd.f32 %v446_v61, %v445_v54  ;;  %v471_v41 = vsub.f32 %v470_v62, %v1024_v25 }
 0x138   : > { %v453_v42 = vadd.f32 %v452_v37, %v451_v23 }
 0x139   : > { %v457_v43 = vmul.f32 0.0625, %v435_v38  ;;  %v458_v44 = vmul.f32 0.0625, %v441_v39  ;;  %v459_v45 = vmul.f32 0.0625, %v447_v40  ;;  %v472_v50 = vmax.f32 %v471_v41, 0.0 }
 0x13a   : > { %v460_v46 = vmul.f32 0.0625, %v453_v42 }
 0x13b   : > { %v461_v47 = vadd.f32 %v457_v43, %v1234_v59  ;;  %v462_v48 = vadd.f32 %v458_v44, %v1237_v35  ;;  %v463_v49 = vadd.f32 %v459_v45, %v1240_v60 }
 0x13c   : > { %v464_v16 = vadd.f32 %v460_v46, %v1243_v36 }
 0x13d   : > { %v1279_v34 = vsub.f32 %v461_v47, %v1018_v20  ;;  %v1282_v26 = vsub.f32 %v462_v48, %v1022_v24  ;;  %v1285_v33 = vsub.f32 %v463_v49, %v1016_v18 }
 0x13e   : > { %v1288_v56 = vsub.f32 %v464_v16, %v1020_v22 }
 0x13f   : > { %v473_v59 = vadd.f32 %v472_v50, %v1279_v34  ;;  %v474_v35 = vadd.f32 %v472_v50, %v1282_v26  ;;  %v475_v60 = vadd.f32 %v472_v50, %v1285_v33 }
 0x140   : > { %v476_v36 = vadd.f32 %v472_v50, %v1288_v56 }
 0x141   : > { %v477_v32 = vsub.f32 %v1257_v51, %v473_v59  ;;  %v478_v31 = vsub.f32 %v1259_v53, %v474_v35  ;;  %v479_v28 = vsub.f32 %v1261_v19, %v475_v60 }
 0x142   : > { %v480_v27 = vsub.f32 %v1263_v55, %v476_v36 }
 0x143   : > { %v481_v63 = vadd.f32 %v477_v32, %v993_v5  ;;  %v482_v0 = vadd.f32 %v478_v31, %v995_v6  ;;  %v483_v1 = vadd.f32 %v479_v28, %v997_v7 }
 0x144   : > { %v484_v2 = vadd.f32 %v480_v27, %v1002_v9 }
 0x145   : > { %v485_v3 = vmul.f32 0.99999, %v481_v63  ;;  %v486_v4 = vmul.f32 0.99999, %v482_v0  ;;  %v487_v8 = vmul.f32 0.99999, %v483_v1 }
 0x146   : > { %v488_v10 = vmul.f32 0.99999, %v484_v2 }
 0x147   : > { %v489_v11 = vmax.f32 %v485_v3, 0.0  ;;  %v490_v12 = vmax.f32 %v486_v4, 0.0  ;;  %v491_v13 = vmax.f32 %v487_v8, 0.0 }
 0x148   : > { %v492_v14 = vmax.f32 %v488_v10, 0.0 }
 0x149   : > { %v1302_v15 = vmin.f32 %v489_v11, 1.0  ;;  %v1304_v17 = vmin.f32 %v490_v12, 1.0  ;;  %v1306_v52 = vmin.f32 %v491_v13, 1.0 }
 0x14a   : > { %v1308_v21 = vmin.f32 %v492_v14, 1.0 }
 0x14b   : > { %v497_v30 = vmul.f32 2.0, %v1302_v15  ;;  %v498_v54 = vmul.f32 2.0, %v1304_v17  ;;  %v499_v57 = vmul.f32 2.0, %v1306_v52 }
 0x14c   : > { %v500_v23 = vmul.f32 2.0, %v1308_v21 }
 0x14d   : > { %v501_v29 = vsub.f32 %v497_v30, %v1257_v51  ;;  %v502_v58 = vsub.f32 %v498_v54, %v1259_v53  ;;  %v503_v61 = vsub.f32 %v499_v57, %v1261_v19 }
 0x14e   : > { %v504_v62 = vsub.f32 %v500_v23, %v1263_v55 }
 0x14f   : > { %v505_v37 = vrot.slane %v501_v29, 4  ;;  %v511_v38 = vrot.slane %v502_v58, 4  ;;  %v517_v39 = vrot.slane %v503_v61, 4  ;;  %v529_v40 = vadd.f32 %v502_v58, %v501_v29 }
 0x150   : > { %v523_v41 = vrot.slane %v504_v62, 4 }
 0x151   : > { %v506_v42 = vadd.f32 %v505_v37, %v501_v29  ;;  %v512_v43 = vadd.f32 %v511_v38, %v502_v58  ;;  %v518_v44 = vadd.f32 %v517_v39, %v503_v61  ;;  %v530_v45 = vadd.f32 %v529_v40, %v503_v61 }
 0x152   : > { %v524_v46 = vadd.f32 %v523_v41, %v504_v62 }
 0x153   : > { %v507_v47 = vrot.slane %v506_v42, 2  ;;  %v513_v48 = vrot.slane %v512_v43, 2  ;;  %v519_v49 = vrot.slane %v518_v44, 2  ;;  %v531_v51 = vadd.f32 %v530_v45, %v504_v62 }
 0x154   : > { %v525_v16 = vrot.slane %v524_v46, 2 }
 0x155   : > { %v508_v53 = vadd.f32 %v507_v47, %v506_v42  ;;  %v514_v59 = vadd.f32 %v513_v48, %v512_v43  ;;  %v520_v19 = vadd.f32 %v519_v49, %v518_v44  ;;  %v544_v35 = vmul.f32 0.125, %v531_v51 }
 0x156   : > { %v526_v55 = vadd.f32 %v525_v16, %v524_v46 }
 0x157   : > { %v509_v60 = vrot.slane %v508_v53, 1  ;;  %v515_v36 = vrot.slane %v514_v59, 1  ;;  %v521_v32 = vrot.slane %v520_v19, 1  ;;  %v545_v31 = vadd.f32 %v544_v35, %v472_v50 }
 0x158   : > { %v527_v28 = vrot.slane %v526_v55, 1 }
 0x159   : > { %v510_v27 = vadd.f32 %v509_v60, %v508_v53  ;;  %v516_v63 = vadd.f32 %v515_v36, %v514_v59  ;;  %v522_v0 = vadd.f32 %v521_v32, %v520_v19  ;;  %v546_v1 = vsub.f32 %v545_v31, %v1024_v25 }
 0x15a   : > { %v528_v2 = vadd.f32 %v527_v28, %v526_v55 }
 0x15b   : > { %v532_v3 = vmul.f32 0.0625, %v510_v27  ;;  %v533_v4 = vmul.f32 0.0625, %v516_v63  ;;  %v534_v8 = vmul.f32 0.0625, %v522_v0  ;;  %v547_v14 = vmax.f32 %v546_v1, 0.0 }
 0x15c   : > { %v535_v10 = vmul.f32 0.0625, %v528_v2 }
 0x15d   : > { %v536_v11 = vadd.f32 %v532_v3, %v1279_v34  ;;  %v537_v12 = vadd.f32 %v533_v4, %v1282_v26  ;;  %v538_v13 = vadd.f32 %v534_v8, %v1285_v33 }
 0x15e   : > { %v539_v50 = vadd.f32 %v535_v10, %v1288_v56 }
 0x15f   : > { %v1324_v30 = vsub.f32 %v536_v11, %v1018_v20  ;;  %v1327_v54 = vsub.f32 %v537_v12, %v1022_v24  ;;  %v1330_v57 = vsub.f32 %v538_v13, %v1016_v18 }
 0x160   : > { %v1333_v23 = vsub.f32 %v539_v50, %v1020_v22 }
 0x161   : > { %v548_v34 = vadd.f32 %v547_v14, %v1324_v30  ;;  %v549_v26 = vadd.f32 %v547_v14, %v1327_v54  ;;  %v550_v33 = vadd.f32 %v547_v14, %v1330_v57 }
 0x162   : > { %v551_v56 = vadd.f32 %v547_v14, %v1333_v23 }
 0x163   : > { %v552_v29 = vsub.f32 %v1302_v15, %v548_v34  ;;  %v553_v58 = vsub.f32 %v1304_v17, %v549_v26  ;;  %v554_v61 = vsub.f32 %v1306_v52, %v550_v33 }
 0x164   : > { %v555_v62 = vsub.f32 %v1308_v21, %v551_v56 }
 0x165   : > { %v556_v37 = vadd.f32 %v552_v29, %v993_v5  ;;  %v557_v38 = vadd.f32 %v553_v58, %v995_v6  ;;  %v558_v39 = vadd.f32 %v554_v61, %v997_v7 }
 0x166   : > { %v559_v40 = vadd.f32 %v555_v62, %v1002_v9 }
 0x167   : > { %v560_v41 = vmul.f32 0.99999, %v556_v37  ;;  %v561_v42 = vmul.f32 0.99999, %v557_v38  ;;  %v562_v43 = vmul.f32 0.99999, %v558_v39 }
 0x168   : > { %v563_v44 = vmul.f32 0.99999, %v559_v40 }
 0x169   : > { %v564_v45 = vmax.f32 %v560_v41, 0.0  ;;  %v565_v46 = vmax.f32 %v561_v42, 0.0  ;;  %v566_v47 = vmax.f32 %v562_v43, 0.0 }
 0x16a   : > { %v567_v48 = vmax.f32 %v563_v44, 0.0 }
 0x16b   : > { %v1347_v49 = vmin.f32 %v564_v45, 1.0  ;;  %v1349_v51 = vmin.f32 %v565_v46, 1.0  ;;  %v1351_v16 = vmin.f32 %v566_v47, 1.0 }
 0x16c   : > { %v1353_v53 = vmin.f32 %v567_v48, 1.0 }
 0x16d   : > { %v572_v59 = vmul.f32 2.0, %v1347_v49  ;;  %v573_v19 = vmul.f32 2.0, %v1349_v51  ;;  %v574_v35 = vmul.f32 2.0, %v1351_v16 }
 0x16e   : > { %v575_v55 = vmul.f32 2.0, %v1353_v53 }
 0x16f   : > { %v576_v60 = vsub.f32 %v572_v59, %v1302_v15  ;;  %v577_v36 = vsub.f32 %v573_v19, %v1304_v17  ;;  %v578_v32 = vsub.f32 %v574_v35, %v1306_v52 }
 0x170   : > { %v579_v31 = vsub.f32 %v575_v55, %v1308_v21 }
 0x171   : > { %v580_v28 = vrot.slane %v576_v60, 4  ;;  %v586_v27 = vrot.slane %v577_v36, 4  ;;  %v592_v63 = vrot.slane %v578_v32, 4  ;;  %v604_v0 = vadd.f32 %v577_v36, %v576_v60 }
 0x172   : > { %v598_v1 = vrot.slane %v579_v31, 4 }
 0x173   : > { %v581_v2 = vadd.f32 %v580_v28, %v576_v60  ;;  %v587_v3 = vadd.f32 %v586_v27, %v577_v36  ;;  %v593_v4 = vadd.f32 %v592_v63, %v578_v32  ;;  %v605_v8 = vadd.f32 %v604_v0, %v578_v32 }
 0x174   : > { %v599_v10 = vadd.f32 %v598_v1, %v579_v31 }
 0x175   : > { %v582_v11 = vrot.slane %v581_v2, 2  ;;  %v588_v12 = vrot.slane %v587_v3, 2  ;;  %v594_v13 = vrot.slane %v593_v4, 2  ;;  %v606_v15 = vadd.f32 %v605_v8, %v579_v31 }
 0x176   : > { %v600_v50 = vrot.slane %v599_v10, 2 }
 0x177   : > { %v583_v17 = vadd.f32 %v582_v11, %v581_v2  ;;  %v589_v34 = vadd.f32 %v588_v12, %v587_v3  ;;  %v595_v52 = vadd.f32 %v594_v13, %v593_v4  ;;  %v619_v26 = vmul.f32 0.125, %v606_v15 }
 0x178   : > { %v601_v21 = vadd.f32 %v600_v50, %v599_v10 }
 0x179   : > { %v584_v33 = vrot.slane %v583_v17, 1  ;;  %v590_v56 = vrot.slane %v589_v34, 1  ;;  %v596_v29 = vrot.slane %v595_v52, 1  ;;  %v620_v58 = vadd.f32 %v619_v26, %v547_v14 }
 0x17a   : > { %v602_v61 = vrot.slane %v601_v21, 1 }
 0x17b   : > { %v585_v62 = vadd.f32 %v584_v33, %v583_v17  ;;  %v591_v37 = vadd.f32 %v590_v56, %v589_v34  ;;  %v597_v38 = vadd.f32 %v596_v29, %v595_v52  ;;  %v621_v39 = vsub.f32 %v620_v58, %v1024_v25 }
 0x17c   : > { %v603_v40 = vadd.f32 %v602_v61, %v601_v21 }
 0x17d   : > { %v607_v41 = vmul.f32 0.0625, %v585_v62  ;;  %v608_v42 = vmul.f32 0.0625, %v591_v37  ;;  %v609_v43 = vmul.f32 0.0625, %v597_v38  ;;  %v622_v48 = vmax.f32 %v621_v39, 0.0 }
 0x17e   : > { %v610_v44 = vmul.f32 0.0625, %v603_v40 }
 0x17f   : > { %v611_v45 = vadd.f32 %v607_v41, %v1324_v30  ;;  %v612_v46 = vadd.f32 %v608_v42, %v1327_v54  ;;  %v613_v47 = vadd.f32 %v609_v43, %v1330_v57 }
 0x180   : > { %v614_v14 = vadd.f32 %v610_v44, %v1333_v23 }
 0x181   : > { %v1369_v59 = vsub.f32 %v611_v45, %v1018_v20  ;;  %v1372_v19 = vsub.f32 %v612_v46, %v1022_v24  ;;  %v1375_v35 = vsub.f32 %v613_v47, %v1016_v18 }
 0x182   : > { %v1378_v55 = vsub.f32 %v614_v14, %v1020_v22 }
 0x183   : > { %v623_v30 = vadd.f32 %v622_v48, %v1369_v59  ;;  %v624_v54 = vadd.f32 %v622_v48, %v1372_v19  ;;  %v625_v57 = vadd.f32 %v622_v48, %v1375_v35 }
 0x184   : > { %v626_v23 = vadd.f32 %v622_v48, %v1378_v55 }
 0x185   : > { %v627_v60 = vsub.f32 %v1347_v49, %v623_v30  ;;  %v628_v36 = vsub.f32 %v1349_v51, %v624_v54  ;;  %v629_v32 = vsub.f32 %v1351_v16, %v625_v57 }
 0x186   : > { %v630_v31 = vsub.f32 %v1353_v53, %v626_v23 }
 0x187   : > { %v631_v28 = vadd.f32 %v627_v60, %v993_v5  ;;  %v632_v27 = vadd.f32 %v628_v36, %v995_v6  ;;  %v633_v63 = vadd.f32 %v629_v32, %v997_v7 }
 0x188   : > { %v634_v0 = vadd.f32 %v630_v31, %v1002_v9 }
 0x189   : > { %v635_v1 = vmul.f32 0.99999, %v631_v28  ;;  %v636_v2 = vmul.f32 0.99999, %v632_v27  ;;  %v637_v3 = vmul.f32 0.99999, %v633_v63 }
 0x18a   : > { %v638_v4 = vmul.f32 0.99999, %v634_v0 }
 0x18b   : > { %v639_v8 = vmax.f32 %v635_v1, 0.0  ;;  %v640_v10 = vmax.f32 %v636_v2, 0.0  ;;  %v641_v11 = vmax.f32 %v637_v3, 0.0 }
 0x18c   : > { %v642_v12 = vmax.f32 %v638_v4, 0.0 }
 0x18d   : > { %v1392_v34 = vmin.f32 %v639_v8, 1.0   ;;  %v1394_v33 = vmin.f32 %v640_v10, 1.0   ;;  %v1396_v32 = vmin.f32 %v641_v11, 1.0  }
 0x18e   : > { %v1398_v31 = vmin.f32 %v642_v12, 1.0  }
 0x18f   : > { %v1456_v13 = vmov %v1392_v34  ;;  %v1457_v15 = vmov %v1394_v33  ;;  %v1458_v50 = vmov %v1396_v32 }
 0x190   : > { %v1459_v17 = vmov %v1398_v31  ;;  %v647_v52 = vmul.f32 2.0, %v1456_v13  ;;  %v648_v26 = vmul.f32 2.0, %v1457_v15  ;;  %v649_v21 = vmul.f32 2.0, %v1458_v50  ;;  %698 = vst [vmem:[#allocation5] sm:$0xff] (%p85_p5), %v1456_v13  ;;  %699 = vst [vmem:[#allocation5 + $0x8] sm:$0xff] (%p85_p5), %v1457_v15 }
 0x191   : > { %v650_v56 = vmul.f32 2.0, %v1459_v17  ;;  %700 = vst [vmem:[#allocation5 + $0x10] sm:$0xff] (%p85_p5), %v1458_v50  ;;  %701 = vst [vmem:[#allocation5 + $0x18] sm:$0xff] (%p85_p5), %v1459_v17 }
 0x192   : > { %v651_v29 = vsub.f32 %v647_v52, %v1347_v49  ;;  %v652_v58 = vsub.f32 %v648_v26, %v1349_v51  ;;  %v653_v34 = vsub.f32 %v649_v21, %v1351_v16 }
 0x193   : > { %v654_v33 = vsub.f32 %v650_v56, %v1353_v53 }
 0x194   : > { %v655_v61 = vrot.slane %v651_v29, 4  ;;  %v661_v62 = vrot.slane %v652_v58, 4  ;;  %v667_v37 = vrot.slane %v653_v34, 4  ;;  %v679_v38 = vadd.f32 %v652_v58, %v651_v29 }
 0x195   : > { %v673_v39 = vrot.slane %v654_v33, 4 }
 0x196   : > { %v656_v40 = vadd.f32 %v655_v61, %v651_v29  ;;  %v662_v41 = vadd.f32 %v661_v62, %v652_v58  ;;  %v668_v42 = vadd.f32 %v667_v37, %v653_v34  ;;  %v680_v43 = vadd.f32 %v679_v38, %v653_v34 }
 0x197   : > { %v674_v44 = vadd.f32 %v673_v39, %v654_v33  ;;  %v1463_v34 = vmov %v1456_v13 }
 0x198   : > { %v657_v45 = vrot.slane %v656_v40, 2  ;;  %v663_v46 = vrot.slane %v662_v41, 2  ;;  %v669_v47 = vrot.slane %v668_v42, 2  ;;  %v681_v49 = vadd.f32 %v680_v43, %v654_v33 }
 0x199   : > { %v675_v14 = vrot.slane %v674_v44, 2  ;;  %v1462_v33 = vmov %v1457_v15 }
 0x19a   : > { %v658_v51 = vadd.f32 %v657_v45, %v656_v40  ;;  %v664_v30 = vadd.f32 %v663_v46, %v662_v41  ;;  %v670_v16 = vadd.f32 %v669_v47, %v668_v42  ;;  %v694_v54 = vmul.f32 0.125, %v681_v49 }
 0x19b   : > { %v676_v53 = vadd.f32 %v675_v14, %v674_v44 }
 0x19c   : > { %v659_v57 = vrot.slane %v658_v51, 1  ;;  %v665_v23 = vrot.slane %v664_v30, 1  ;;  %v671_v60 = vrot.slane %v670_v16, 1  ;;  %v695_v36 = vadd.f32 %v694_v54, %v622_v48 }
 0x19d   : > { %v677_v32 = vrot.slane %v676_v53, 1 }
 0x19e   : > { %v660_v31 = vadd.f32 %v659_v57, %v658_v51  ;;  %v666_v28 = vadd.f32 %v665_v23, %v664_v30  ;;  %v672_v27 = vadd.f32 %v671_v60, %v670_v16  ;;  %v696_v63 = vsub.f32 %v695_v36, %v1024_v25 }
 0x19f   : > { %v678_v0 = vadd.f32 %v677_v32, %v676_v53  ;;  %v1461_v32 = vmov %v1458_v50 }
 0x1a0   : > { %v682_v1 = vmul.f32 0.0625, %v660_v31  ;;  %v683_v2 = vmul.f32 0.0625, %v666_v28  ;;  %v684_v3 = vmul.f32 0.0625, %v672_v27  ;;  %v697_v26 = vmax.f32 %v696_v63, 0.0  }
 0x1a1   : > { %v685_v4 = vmul.f32 0.0625, %v678_v0  ;;  %v1460_v31 = vmov %v1459_v17  ;;  %87 = sbr.rel (!%p85_p5) target bundleno = 149 (0x95), region = 43 }
 0x1a2   : > { %v686_v8 = vadd.f32 %v682_v1, %v1369_v59  ;;  %v687_v10 = vadd.f32 %v683_v2, %v1372_v19  ;;  %v688_v11 = vadd.f32 %v684_v3, %v1375_v35 }
 0x1a3   : > { %v689_v48 = vadd.f32 %v685_v4, %v1378_v55 }
 0x1a4   : > { %v690_v30 = vsub.f32 %v686_v8, %v1018_v20   ;;  %v691_v29 = vsub.f32 %v687_v10, %v1022_v24   ;;  %v692_v28 = vsub.f32 %v688_v11, %v1016_v18  }
 0x1a5   : > { %v693_v27 = vsub.f32 %v689_v48, %v1020_v22  }
 0x1a6   :  { %869 = shalt.err (!%p866_p10)
}
 0x1a7   :  { %713 = dma.vmem_to_hbm [thread:$0]  %s708_s28, 512, %s1455_s3, [#allocation4], %s963_s15, %s963_s15, %s964_s16  }
 0x1a8   :  { %920 = dma.done.wait [#allocation4], 512  }
 0x1a9   :  { %921 = vsyncadd [#allocation4], 4294966784 }
 0x1aa   :  { %717 = vsyncpa [#allocation3], 1 }
 0x1ab   :  { %718 = vsyncpa [#allocation4], 1 }

</bundles_post_ra>
